<compile_context>
chip_gen: v5e
topology: v5e:2x2
jax: 0.10.0
libtpu: 0.0.40
codegen_flags: <defaults>
</compile_context>

<pallas_src>
import jax
import jax.numpy as jnp
from jax.experimental import pallas as pl
from jax.experimental.pallas import tpu as pltpu


def _projector_kernel(x_ref, o_ref):
    # x_ref: (TB, c)   VMEM tile of latents for this grid step
    # o_ref: (TB, c, c) VMEM tile of the output
    row = x_ref[...].astype(jnp.float32)                      # (TB, c)
    o_ref[...] = jnp.broadcast_to(row[:, None, :], o_ref.shape)


def projector(x, c, target_tile_bytes=2 * 1024 * 1024):
    """Pallas equivalent of Projector.forward for x of shape (B, c)."""
    B = x.shape[0]
    assert x.shape[1] == c, "last dim of x must equal c"

    bytes_per_sample = c * c * 4  # f32 output per sample

    if B * bytes_per_sample <= target_tile_bytes:
        # Whole batch fits in one comfortable tile: single step, no padding.
        tb = B
        b_padded = B
    else:
        # Aim for ~target_tile_bytes of output per step; keep TB a multiple of 8
        # so the (TB, c) input block satisfies the sublane rule after padding.
        tb = max(1, target_tile_bytes // bytes_per_sample)
        tb = max(8, (tb // 8) * 8)
        tb = min(tb, ((B + 7) // 8) * 8)
        b_padded = pl.cdiv(B, tb) * tb

    xp = x if b_padded == B else jnp.pad(x, ((0, b_padded - B), (0, 0)))
    num_steps = b_padded // tb

    out = pl.pallas_call(
        _projector_kernel,
        out_shape=jax.ShapeDtypeStruct((b_padded, c, c), jnp.float32),
        grid=(num_steps,),
        in_specs=[pl.BlockSpec((tb, c), lambda i: (i, 0))],
        out_specs=pl.BlockSpec((tb, c, c), lambda i: (i, 0, 0)),
        compiler_params=pltpu.CompilerParams(
            dimension_semantics=("parallel",),
        ),
    )(xp)

    return out[:B] if b_padded != B else out


if __name__ == "__main__":
    # Small deterministic example (module default c=256; scaled down per spec).
    B, C = 2, 128
    key = jax.random.PRNGKey(0)
    x = jax.random.normal(key, (B, C), dtype=jnp.float32)

    out = projector(x, C)
    out = jax.block_until_ready(out)

    # Reference semantics: xx[i, j, :] = x[i, :]
    ref = jnp.broadcast_to(x[:, None, :], (B, C, C)).astype(jnp.float32)

    assert out.shape == (B, C, C)
    assert out.dtype == jnp.float32
    assert jnp.allclose(out, ref), "mismatch vs reference broadcast"

    # Also exercise the batched/padded path (B not a multiple of TB).
    B2, C2 = 37, 128
    x2 = jax.random.normal(jax.random.PRNGKey(1), (B2, C2), dtype=jnp.float32)
    out2 = jax.block_until_ready(projector(x2, C2, target_tile_bytes=512 * 1024))
    ref2 = jnp.broadcast_to(x2[:, None, :], (B2, C2, C2)).astype(jnp.float32)
    assert out2.shape == (B2, C2, C2)
    assert jnp.allclose(out2, ref2), "mismatch vs reference broadcast (padded path)"

    print("KERNEL_OK")
</pallas_src>

<mosaic_0001>
module attributes {stable_mosaic.version = 11 : i64} {
  func.func @_projector_kernel(%arg0: i32, %arg1: memref<2x128xf32, #tpu.memory_space<vmem>>, %arg2: memref<2x128x128xf32, #tpu.memory_space<vmem>>) attributes {dimension_semantics = [#tpu.dimension_semantics<parallel>], iteration_bounds = array<i64: 1>, scalar_prefetch = 0 : i64, scratch_operands = 0 : i64, tpu.core_type = #tpu.core_type<tc>, window_params = [{transform_indices = @transform_0, window_bounds = array<i64: 2, 128>}, {transform_indices = @transform_1, window_bounds = array<i64: 2, 128, 128>}]} {
    %c0 = arith.constant 0 : index
    %c0_0 = arith.constant 0 : index
    %0 = vector.load %arg1[%c0, %c0_0] : memref<2x128xf32, #tpu.memory_space<vmem>>, vector<2x128xf32>
    %1 = vector.shape_cast %0 : vector<2x128xf32> to vector<2x1x128xf32>
    %2 = vector.shape_cast %1 : vector<2x1x128xf32> to vector<2x1x128xf32>
    %3 = vector.broadcast %2 : vector<2x1x128xf32> to vector<2x128x128xf32>
    %c0_1 = arith.constant 0 : index
    %c0_2 = arith.constant 0 : index
    %c0_3 = arith.constant 0 : index
    %4 = vector.load %arg2[%c0_1, %c0_2, %c0_3] : memref<2x128x128xf32, #tpu.memory_space<vmem>>, vector<2x128x128xf32>
    tpu.vector_store %arg2[%c0_1, %c0_2, %c0_3], %3 {strides = array<i32>} : memref<2x128x128xf32, #tpu.memory_space<vmem>>, vector<2x128x128xf32>,
    return
  }
  func.func @transform_0(%arg0: i32) -> (i32, i32) {
    %c0_i32 = arith.constant 0 : i32
    %c0_i32_0 = arith.constant 0 : i32
    return %arg0, %c0_i32 : i32, i32
  }
  func.func @transform_1(%arg0: i32) -> (i32, i32, i32) {
    %c0_i32 = arith.constant 0 : i32
    %c0_i32_0 = arith.constant 0 : i32
    %c0_i32_1 = arith.constant 0 : i32
    return %arg0, %c0_i32, %c0_i32_0 : i32, i32, i32
  }
}

</mosaic_0001>

<bundles_post_ra>
// kernel: tpu_custom_call.1
= control target key start
LH: loop header
LB: loop body
LE: loop exit
PB: predicated region body
PF: predicated region fallthrough
CT: control target
= control target key end

     0   :  { %6 = vsyncpa [#allocation3], 0  ;;  %s157_s0 = inlined_call_operand.hbm [shape: f32[2,128], index: 0, kind: input, shape index: {}]   ;;  %s158_s1 = inlined_call_operand.hbm [shape: f32[2,128,128], index: 1, kind: output, shape index: {}]  }
   0x1   :  { %7 = vsyncpa [#allocation4], 0  ;;  %s13_s8 = sshll.u32 %s157_s0, 4  ;;  %s137_s9 = smov [#allocation2]   ;;  %s14_s8 = int_to_ptr.hbm [resolvable:$true] %s13_s8 }
   0x2   :  { %s15_s10 = sshll.u32 %s137_s9, 4  ;;  %s16_s10 = int_to_ptr.vmem [resolvable:$true] %s15_s10 }
   0x3   :  { %18 = dma.hbm_to_vmem [thread:$0]  %s14_s8, 32, %s16_s10, [#allocation3]  }
   0x4   :  { %133 = dma.done.wait [#allocation3], 32  }
   0x5   :  { %134 = vsyncadd [#allocation3], 4294967264  ;;  %v23_v0 = vld [vmem:[#allocation2] sm:$0x3]  ;;  %s138_s0 = smov [#allocation5]   ;;  %s68_s14 = sshll.u32 %s158_s1, 4  ;;  %s69_s14 = int_to_ptr.hbm [resolvable:$true] %s68_s14 }
   0x6   :  { %v26_v1 = vperm.slane %v23_v0, 0  ;;  %v25_v2 = vrot.slane %v23_v0, 1  ;;  %s66_s11 = sshll.u32 %s138_s0, 4  ;;  %s139_s15 = smov 128   ;;  %s67_s11 = int_to_ptr.vmem [resolvable:$true] %s66_s11 }
   0x7   :  { %s140_s16 = smov 8  }
   0x8   :  { %30 = vst [vmem:[#allocation5] sm:$0xff] %v26_v1  ;;  %v27_v3 = vperm.slane %v25_v2, 0 }
   0x9   :  { %31 = vst [vmem:[#allocation5 + $0x8] sm:$0xff] %v26_v1 }
   0xa   :  { %32 = vst [vmem:[#allocation5 + $0x10] sm:$0xff] %v26_v1 }
   0xb   :  { %33 = vst [vmem:[#allocation5 + $0x18] sm:$0xff] %v26_v1 }
   0xc   :  { %34 = vst [vmem:[#allocation5 + $0x20] sm:$0xff] %v26_v1 }
   0xd   :  { %35 = vst [vmem:[#allocation5 + $0x28] sm:$0xff] %v26_v1 }
   0xe   :  { %36 = vst [vmem:[#allocation5 + $0x30] sm:$0xff] %v26_v1 }
   0xf   :  { %37 = vst [vmem:[#allocation5 + $0x38] sm:$0xff] %v26_v1 }
  0x10   :  { %38 = vst [vmem:[#allocation5 + $0x40] sm:$0xff] %v26_v1 }
  0x11   :  { %39 = vst [vmem:[#allocation5 + $0x48] sm:$0xff] %v26_v1 }
  0x12   :  { %40 = vst [vmem:[#allocation5 + $0x50] sm:$0xff] %v26_v1 }
  0x13   :  { %41 = vst [vmem:[#allocation5 + $0x58] sm:$0xff] %v26_v1 }
  0x14   :  { %42 = vst [vmem:[#allocation5 + $0x60] sm:$0xff] %v26_v1 }
  0x15   :  { %43 = vst [vmem:[#allocation5 + $0x68] sm:$0xff] %v26_v1 }
  0x16   :  { %44 = vst [vmem:[#allocation5 + $0x70] sm:$0xff] %v26_v1 }
  0x17   :  { %45 = vst [vmem:[#allocation5 + $0x78] sm:$0xff] %v26_v1 }
  0x18   :  { %46 = vst [vmem:[#allocation5 + $0x80] sm:$0xff] %v27_v3 }
  0x19   :  { %47 = vst [vmem:[#allocation5 + $0x88] sm:$0xff] %v27_v3 }
  0x1a   :  { %48 = vst [vmem:[#allocation5 + $0x90] sm:$0xff] %v27_v3 }
  0x1b   :  { %49 = vst [vmem:[#allocation5 + $0x98] sm:$0xff] %v27_v3 }
  0x1c   :  { %50 = vst [vmem:[#allocation5 + $0xa0] sm:$0xff] %v27_v3 }
  0x1d   :  { %51 = vst [vmem:[#allocation5 + $0xa8] sm:$0xff] %v27_v3 }
  0x1e   :  { %52 = vst [vmem:[#allocation5 + $0xb0] sm:$0xff] %v27_v3 }
  0x1f   :  { %53 = vst [vmem:[#allocation5 + $0xb8] sm:$0xff] %v27_v3 }
  0x20   :  { %54 = vst [vmem:[#allocation5 + $0xc0] sm:$0xff] %v27_v3 }
  0x21   :  { %55 = vst [vmem:[#allocation5 + $0xc8] sm:$0xff] %v27_v3 }
  0x22   :  { %56 = vst [vmem:[#allocation5 + $0xd0] sm:$0xff] %v27_v3 }
  0x23   :  { %57 = vst [vmem:[#allocation5 + $0xd8] sm:$0xff] %v27_v3 }
  0x24   :  { %58 = vst [vmem:[#allocation5 + $0xe0] sm:$0xff] %v27_v3 }
  0x25   :  { %59 = vst [vmem:[#allocation5 + $0xe8] sm:$0xff] %v27_v3 }
  0x26   :  { %60 = vst [vmem:[#allocation5 + $0xf0] sm:$0xff] %v27_v3 }
  0x27   :  { %61 = vst [vmem:[#allocation5 + $0xf8] sm:$0xff] %v27_v3 }
  0x28   :  { %74 = dma.vmem_to_hbm [thread:$0]  %s67_s11, 4096, %s69_s14, [#allocation4], %s139_s15, %s139_s15, %s140_s16  }
  0x29   :  { %135 = dma.done.wait [#allocation4], 4096  }
  0x2a   :  { %136 = vsyncadd [#allocation4], 4294963200 }
  0x2b   :  { %79 = vsyncpa [#allocation3], 1 }
  0x2c   :  { %80 = vsyncpa [#allocation4], 1 }

</bundles_post_ra>
